<compile_context>
chip_gen: v7x
topology: tpu7x:2x2x1
jax: 0.10.0
libtpu: 0.0.40
codegen_flags: <defaults>
</compile_context>

<pallas_src>
import functools
import math

import jax
import jax.numpy as jnp
from jax.experimental import pallas as pl
from jax.experimental.pallas import tpu as pltpu


def _planar_kernel_folded(z_ref, gw_ref, s_ref, b_ref, o_ref, *, precision):
    # z_ref: (TM, L) packed samples (fold samples per physical row)
    # gw_ref: (L, L) block-diagonal matrix with the weight folded in
    # s_ref:  (1, L) f32 tiled scale;  b_ref: (1,) f32 scalar in SMEM
    z = z_ref[...]                                     # native dtype (residual path)
    # Segmented reduce + in-group broadcast in one MXU matmul:
    #   act[r, j] = sum_{k in group(j)} z[r, k] * w[k mod D] + b
    act = jnp.dot(z, gw_ref[...], precision=precision,
                  preferred_element_type=jnp.float32) + b_ref[0]
    o_ref[...] = z + (s_ref[...] * jnp.tanh(act)).astype(z.dtype)


def _planar_kernel_wide(z_ref, w_ref, s_ref, b_ref, o_ref, *, precision):
    # z_ref: (TM, D);  w_ref: (D, 1);  s_ref: (1, D) f32;  b_ref: (1,) f32 SMEM
    z = z_ref[...]
    act = jnp.dot(z, w_ref[...], precision=precision,
                  preferred_element_type=jnp.float32) + b_ref[0]     # (TM, 1)
    o_ref[...] = z + (s_ref[...] * jnp.tanh(act)).astype(z.dtype)


def _round_up(x, m):
    return ((x + m - 1) // m) * m


def _vmem_budget_bytes():
    # Budget for the double-buffered (in + out) z tiles.  Smaller on v5e: its
    # f32 MXU is slow enough that very large tiles stop hiding the reduce.
    try:
        kind = jax.devices()[0].device_kind.lower()
    except Exception:
        kind = ""
    if "v5 lite" in kind or "v5e" in kind or "v5litepod" in kind:
        return 8 * 1024 * 1024
    return 16 * 1024 * 1024


def _pick_tm(rows, lane, itemsize, budget_bytes, max_rows=8192):
    """Rows per grid step: as large as the VMEM budget allows, multiple of 8,
    but small enough that the 1-D grid has >= 2 steps (v7x megacore)."""
    if rows <= 8:
        return rows                       # single block equal to the full dim
    cap = budget_bytes // (4 * lane * itemsize)        # 2x in + 2x out buffers
    cap = max(8, min(max_rows, (cap // 8) * 8))
    tm = _round_up(pl.cdiv(rows, 2), 8)
    return max(8, min(cap, tm))


def _vmem_limit_bytes(buffers_bytes):
    # Pipeline buffers + compiler temporaries, with headroom; stays under the
    # 64 MiB/TC physical VMEM of v7x.
    return int(min(48 * 1024 * 1024, max(24 * 1024 * 1024, 3 * buffers_bytes)))


def planar_flow(z, weight, scale, bias, *, max_lane=512):
    """out = z + scale * tanh(z @ weight.T + bias)   (z: (N, D))."""
    N, D = z.shape
    itemsize = jnp.dtype(z.dtype).itemsize

    if z.dtype == jnp.float32:
        cdtype = jnp.float32
        precision = jax.lax.Precision.HIGHEST     # f32 parity with reference
    else:
        cdtype = z.dtype                          # e.g. bf16: native MXU rate
        precision = None

    w = jnp.asarray(weight, jnp.float32).reshape(1, D)
    s = jnp.asarray(scale, jnp.float32).reshape(1, D)
    bias_smem = jnp.asarray(bias, jnp.float32).reshape(1)

    budget = _vmem_budget_bytes()
    cparams_sem = ("parallel",)

    # Lane-dense folding: pack `fold` samples per physical row so every store
    # is a full (multiple-of-)128-lane store.
    L = math.lcm(D, 128) if D < 128 else D
    fold = L // D if (D < 128 and L <= max_lane) else 1

    if fold > 1:
        rem = (-N) % fold
        z_in = jnp.pad(z, ((0, rem), (0, 0))) if rem else z   # rare, tiny pad
        rows = (N + rem) // fold
        z2 = z_in.reshape(rows, L)                             # free reshape

        grp = jnp.arange(L, dtype=jnp.int32) // D
        gmask = (grp[:, None] == grp[None, :]).astype(jnp.float32)   # (L, L)
        w_tiled = jnp.tile(w, (1, fold)).reshape(L)
        gw = (gmask * w_tiled[:, None]).astype(cdtype)                # weight folded in
        s2 = jnp.tile(s, (1, fold))                                   # (1, L) f32

        tm = _pick_tm(rows, L, itemsize, budget)
        grid = (pl.cdiv(rows, tm),)
        buffers = 4 * tm * L * itemsize

        out2 = pl.pallas_call(
            functools.partial(_planar_kernel_folded, precision=precision),
            out_shape=jax.ShapeDtypeStruct((rows, L), z.dtype),
            grid_spec=pltpu.PrefetchScalarGridSpec(
                num_scalar_prefetch=0,
                grid=grid,
                in_specs=[
                    pl.BlockSpec((tm, L), lambda i: (i, 0)),   # packed z tile
                    pl.BlockSpec((L, L), lambda i: (0, 0)),    # block-diag G*w
                    pl.BlockSpec((1, L), lambda i: (0, 0)),    # tiled scale
                    pl.BlockSpec(memory_space=pltpu.MemorySpace.SMEM),  # bias
                ],
                out_specs=pl.BlockSpec((tm, L), lambda i: (i, 0)),
            ),
            compiler_params=pltpu.CompilerParams(
                dimension_semantics=cparams_sem,
                vmem_limit_bytes=_vmem_limit_bytes(buffers)),
            cost_estimate=pl.CostEstimate(
                flops=2 * rows * L * L + 4 * rows * L,
                transcendentals=rows * L,
                bytes_accessed=2 * rows * L * itemsize + L * L * itemsize),
        )(z2, gw, s2, bias_smem)

        out = out2.reshape(rows * fold, D)
        return out[:N] if rem else out

    # Wide / non-foldable path (D >= 128, or D < 128 with lcm(D,128) too big).
    tm = _pick_tm(N, D, itemsize, budget)
    grid = (pl.cdiv(N, tm),)
    buffers = 4 * tm * D * itemsize
    w_col = w.reshape(D, 1).astype(cdtype)

    out = pl.pallas_call(
        functools.partial(_planar_kernel_wide, precision=precision),
        out_shape=jax.ShapeDtypeStruct((N, D), z.dtype),
        grid_spec=pltpu.PrefetchScalarGridSpec(
            num_scalar_prefetch=0,
            grid=grid,
            in_specs=[
                pl.BlockSpec((tm, D), lambda i: (i, 0)),       # z tile
                pl.BlockSpec((D, 1), lambda i: (0, 0)),        # weight column
                pl.BlockSpec((1, D), lambda i: (0, 0)),        # scale
                pl.BlockSpec(memory_space=pltpu.MemorySpace.SMEM),  # bias
            ],
            out_specs=pl.BlockSpec((tm, D), lambda i: (i, 0)),
        ),
        compiler_params=pltpu.CompilerParams(
            dimension_semantics=cparams_sem,
            vmem_limit_bytes=_vmem_limit_bytes(buffers)),
        cost_estimate=pl.CostEstimate(
            flops=2 * N * D + 4 * N * D,
            transcendentals=N,
            bytes_accessed=2 * N * D * itemsize),
    )(z, w_col, s, bias_smem)
    return out


def planar_flow_ref(z, weight, scale, bias):
    act = z @ weight.T + bias          # (N, 1)
    return z + scale * jnp.tanh(act)   # (N, dim)


def _check(out, ref, atol=1e-5, rtol=1e-5):
    assert out.shape == ref.shape
    assert jnp.allclose(out, ref, atol=atol, rtol=rtol), float(
        jnp.max(jnp.abs(out - ref)))


if __name__ == "__main__":
    key = jax.random.PRNGKey(0)
    k_z, k_w, k_s, k_b = jax.random.split(key, 4)

    # Small shapes consistent with the module (batch=16, dim=32): folded path.
    N, dim = 16, 32
    weight = jax.random.uniform(k_w, (1, dim), jnp.float32, -0.01, 0.01)
    scale = jax.random.uniform(k_s, (1, dim), jnp.float32, -0.01, 0.01)
    bias = jax.random.uniform(k_b, (1,), jnp.float32, -0.01, 0.01)
    z = jax.random.normal(k_z, (N, dim), jnp.float32)

    out = jax.block_until_ready(planar_flow(z, weight, scale, bias))
    _check(out, planar_flow_ref(z, weight, scale, bias))

    # Wide path (dim >= 128), grid of 2 steps.
    dim2 = 128
    k_z2, k_w2, k_s2 = jax.random.split(k_z, 3)
    weight2 = jax.random.uniform(k_w2, (1, dim2), jnp.float32, -0.01, 0.01)
    scale2 = jax.random.uniform(k_s2, (1, dim2), jnp.float32, -0.01, 0.01)
    z2 = jax.random.normal(k_z2, (N, dim2), jnp.float32)
    out2 = jax.block_until_ready(planar_flow(z2, weight2, scale2, bias))
    _check(out2, planar_flow_ref(z2, weight2, scale2, bias))

    # Folded path with a partial (non-divisible) last block: rows=25, tm=16.
    N3, dim3 = 100, 32
    k_z3, k_w3, k_s3 = jax.random.split(k_w, 3)
    weight3 = jax.random.uniform(k_w3, (1, dim3), jnp.float32, -0.01, 0.01)
    scale3 = jax.random.uniform(k_s3, (1, dim3), jnp.float32, -0.01, 0.01)
    z3 = jax.random.normal(k_z3, (N3, dim3), jnp.float32)
    out3 = jax.block_until_ready(planar_flow(z3, weight3, scale3, bias))
    _check(out3, planar_flow_ref(z3, weight3, scale3, bias))

    print("KERNEL_OK")
</pallas_src>

<mosaic_0001>
module attributes {stable_mosaic.version = 11 : i64} {
  func.func @_planar_kernel_folded(%arg0: i32, %arg1: memref<4x128xf32, #tpu.memory_space<vmem>>, %arg2: memref<128x128xf32, #tpu.memory_space<vmem>>, %arg3: memref<1x128xf32, #tpu.memory_space<vmem>>, %arg4: memref<1xf32, #tpu.memory_space<smem>>, %arg5: memref<4x128xf32, #tpu.memory_space<vmem>>) attributes {dimension_semantics = [#tpu.dimension_semantics<parallel>], iteration_bounds = array<i64: 1>, scalar_prefetch = 0 : i64, scratch_operands = 0 : i64, tpu.core_type = #tpu.core_type<tc>, window_params = [{transform_indices = @transform_0, window_bounds = array<i64: 4, 128>}, {pipeline_mode = #tpu.pipeline_mode<synchronous>, transform_indices = @transform_1, window_bounds = array<i64: 128, 128>}, {pipeline_mode = #tpu.pipeline_mode<synchronous>, transform_indices = @transform_2, window_bounds = array<i64: 1, 128>}, {transform_indices = @transform_3, window_bounds = array<i64: 1>}, {transform_indices = @transform_4, window_bounds = array<i64: 4, 128>}]} {
    %c0 = arith.constant 0 : index
    %c0_0 = arith.constant 0 : index
    %0 = vector.load %arg1[%c0, %c0_0] : memref<4x128xf32, #tpu.memory_space<vmem>>, vector<4x128xf32>
    %c0_1 = arith.constant 0 : index
    %c0_2 = arith.constant 0 : index
    %1 = vector.load %arg2[%c0_1, %c0_2] : memref<128x128xf32, #tpu.memory_space<vmem>>, vector<128x128xf32>
    %cst = arith.constant dense<0.000000e+00> : vector<4x128xf32>
    %2 = tpu.matmul %0, %1, %cst {dimension_numbers = #tpu.dot_dimension_numbers<[1], [0], [0], [1], [0, 0, 1, 1], [], []>, precision = #tpu.contract_precision<fp32>} : vector<4x128xf32>, vector<128x128xf32>, vector<4x128xf32> -> vector<4x128xf32>
    %c0_3 = arith.constant 0 : index
    %3 = memref.load %arg4[%c0_3] : memref<1xf32, #tpu.memory_space<smem>>
    %4 = vector.broadcast %3 : f32 to vector<4x128xf32>
    %5 = arith.addf %2, %4 : vector<4x128xf32>
    %c0_4 = arith.constant 0 : index
    %c0_5 = arith.constant 0 : index
    %6 = vector.load %arg3[%c0_4, %c0_5] : memref<1x128xf32, #tpu.memory_space<vmem>>, vector<1x128xf32>
    %7 = math.tanh %5 : vector<4x128xf32>
    %8 = vector.broadcast %6 : vector<1x128xf32> to vector<4x128xf32>
    %9 = arith.mulf %8, %7 : vector<4x128xf32>
    %10 = arith.addf %0, %9 : vector<4x128xf32>
    %c0_6 = arith.constant 0 : index
    %c0_7 = arith.constant 0 : index
    %11 = vector.load %arg5[%c0_6, %c0_7] : memref<4x128xf32, #tpu.memory_space<vmem>>, vector<4x128xf32>
    tpu.vector_store %arg5[%c0_6, %c0_7], %10 {strides = array<i32>} : memref<4x128xf32, #tpu.memory_space<vmem>>, vector<4x128xf32>,
    return
  }
  func.func @transform_0(%arg0: i32) -> (i32, i32) {
    %c0_i32 = arith.constant 0 : i32
    %c0_i32_0 = arith.constant 0 : i32
    return %arg0, %c0_i32 : i32, i32
  }
  func.func @transform_1(%arg0: i32) -> (i32, i32) {
    %c0_i32 = arith.constant 0 : i32
    %c0_i32_0 = arith.constant 0 : i32
    %c0_i32_1 = arith.constant 0 : i32
    return %c0_i32, %c0_i32_0 : i32, i32
  }
  func.func @transform_2(%arg0: i32) -> (i32, i32) {
    %c0_i32 = arith.constant 0 : i32
    %c0_i32_0 = arith.constant 0 : i32
    %c0_i32_1 = arith.constant 0 : i32
    return %c0_i32, %c0_i32_0 : i32, i32
  }
  func.func @transform_3(%arg0: i32) -> i32 {
    %c0_i32 = arith.constant 0 : i32
    %c0_i32_0 = arith.constant 0 : i32
    return %c0_i32 : i32
  }
  func.func @transform_4(%arg0: i32) -> (i32, i32) {
    %c0_i32 = arith.constant 0 : i32
    %c0_i32_0 = arith.constant 0 : i32
    return %arg0, %c0_i32 : i32, i32
  }
}

</mosaic_0001>

<bundles_post_ra>
// kernel: tpu_custom_call.1
= control target key start
LH: loop header
LB: loop body
LE: loop exit
PB: predicated region body
PF: predicated region fallthrough
CT: control target
= control target key end

     0   :  { %10 = vsyncpa [#allocation4], 0  ;;  %s1615_s0 = inlined_call_operand.hbm [shape: f32[4,128], index: 0, kind: input, shape index: {}]   ;;  %s1616_s1 = inlined_call_operand.hbm [shape: f32[128,128], index: 1, kind: input, shape index: {}]   ;;  %s1617_s2 = inlined_call_operand.vmem [shape: f32[1,128], index: 2, kind: input, shape index: {}]   ;;  %s1618_s3 = inlined_call_operand.<no memory space> [shape: f32[1], index: 3, kind: input, shape index: {}]   ;;  %s1619_s4 = inlined_call_operand.hbm [shape: f32[4,128], index: 4, kind: output, shape index: {}]  }
   0x1   :  { %11 = vsyncpa [#allocation7], 0 }
   0x2   :  { %12 = vsyncpa [#allocation5], 0  ;;  %s1281_s15 = smov [#allocation3]   ;;  %s1282_s17 = smov [#allocation6]  }
   0x3   :  { %s19_s16 = sshll.u32 %s1281_s15, 4  ;;  %s28_s18 = sshll.u32 %s1282_s17, 4  ;;  %s20_s16 = int_to_ptr.vmem [resolvable:$true] %s19_s16  ;;  %s1314_s18 = int_to_ptr.vmem [resolvable:$true] %s28_s18 }
   0x4   :  { %s1209_s21 = scalar_lea.hbm %s1615_s0, 64 }
   0x5   :  { %p1210_p0 = scmp.ne.s32.totalorder %s1615_s0, %s1209_s21  ;;  %p1213_p1 = scmp.lt.u32.totalorder %s1209_s21, %s1615_s0 }
   0x7   :  { %p1215_p2 = pnand %p1213_p1, %p1210_p0 }
   0x9   :  { %1218 = shalt.err (!%p1215_p2)
}
   0xa   :  { %s1219_s26 = scalar_lea.vmem %s20_s16, 64  ;;  %p1224_p4 = scmp.lt.s32.totalorder %s20_s16, %s20_s16 }
   0xb   :  { %p1220_p3 = scmp.ne.s32.totalorder %s20_s16, %s1219_s26  ;;  %p1225_p5 = scmp.lt.s32.totalorder %s1219_s26, %s1219_s26 }
   0xd   :  { %p1226_p6 = por %p1225_p5, %p1224_p4 }
   0xf   :  { %p1227_p7 = pnand %p1226_p6, %p1220_p3 }
  0x11   :  { %1230 = shalt.err (!%p1227_p7)
}
  0x12   :  { %22 = dma.hbm_to_vmem [thread:$0]  %s1615_s0, 64, %s20_s16, [#allocation4]  }
  0x13   :  { %s1231_s5 = scalar_lea.hbm %s1616_s1, 2048 }
  0x14   :  { %p1232_p8 = scmp.ne.s32.totalorder %s1616_s1, %s1231_s5  ;;  %p1235_p9 = scmp.lt.u32.totalorder %s1231_s5, %s1616_s1 }
  0x16   :  { %p1237_p10 = pnand %p1235_p9, %p1232_p8 }
  0x18   :  { %1240 = shalt.err (!%p1237_p10)
}
  0x19   :  { %s1241_s10 = scalar_lea.vmem %s1314_s18, 2048  ;;  %p1246_p12 = scmp.lt.s32.totalorder %s1314_s18, %s1314_s18 }
  0x1a   :  { %p1242_p11 = scmp.ne.s32.totalorder %s1314_s18, %s1241_s10  ;;  %p1247_p13 = scmp.lt.s32.totalorder %s1241_s10, %s1241_s10 }
  0x1c   :  { %p1248_p0 = por %p1247_p13, %p1246_p12 }
  0x1e   :  { %p1249_p1 = pnand %p1248_p0, %p1242_p11 }
  0x20   :  { %1252 = shalt.err (!%p1249_p1)
}
  0x21   :  { %s1283_s0 = smov 128   ;;  %s1284_s11 = smov 8  }
  0x22   :  { %34 = dma.hbm_to_vmem [thread:$0]  %s1616_s1, 2048, %s1314_s18, [#allocation7], %s1283_s0, %s1283_s0, %s1284_s11  }
  0x23   :  { %1275 = dma.done.wait [#allocation4], 64  }
  0x24   :  { %1276 = vsyncadd [#allocation4], 4294967232 }
  0x25   :  { %1277 = dma.done.wait [#allocation7], 2048  }
  0x26   :  { %1278 = vsyncadd [#allocation7], 4294965248  ;;  %v1285_v0 = vmov 0.0|0.0   ;;  %vm1286_vm0 = vmmov 0   ;;  %v1287_v1 = vmov 0.0   ;;  %v46_v2 = vld [vmem:[#allocation6] sm:$0xff] }
  0x27   :  { %1045 = vmatprep.subr.bf16.mxu1 %v1285_v0  ;;  %1117 = vmatprep.subr.bf16.mxu0 %v1285_v0  ;;  %v47_v3 = vld [vmem:[#allocation6 + $0x8] sm:$0xff]  ;;  %v48_v4 = vld [vmem:[#allocation6 + $0x10] sm:$0xff]  ;;  %v65_v5 = vand.u32 4294901760, %v46_v2  ;;  %v49_v7 = vld [vmem:[#allocation6 + $0x18] sm:$0xff]  ;;  %s1288_s17 = smov [#allocation8]  }
  0x28   :  { %867 = vmatprep.mubr.msk.f32.mxu1 %vm1286_vm0, %v1287_v1  ;;  %972 = vmatprep.mubr.msk.f32.mxu0 %vm1286_vm0, %v1287_v1  ;;  %v68_v6 = vand.u32 4294901760, %v47_v3  ;;  %v71_v8 = vand.u32 4294901760, %v48_v4  ;;  %v74_v9 = vand.u32 4294901760, %v49_v7  ;;  %v50_v10 = vld [vmem:[#allocation6 + $0x20] sm:$0xff]  ;;  %v51_v11 = vld [vmem:[#allocation6 + $0x28] sm:$0xff]  ;;  %v52_v16 = vld [vmem:[#allocation6 + $0x30] sm:$0xff] }
  0x29   :  { %v77_v14 = vand.u32 4294901760, %v50_v10  ;;  %v80_v15 = vand.u32 4294901760, %v51_v11  ;;  %v53_v17 = vld [vmem:[#allocation6 + $0x38] sm:$0xff]  ;;  %v83_v19 = vand.u32 4294901760, %v52_v16  ;;  %v1365_v21 = vld [vmem:[#allocation6 + $0x40] sm:$0xff]  ;;  %v1367_v22 = vld [vmem:[#allocation6 + $0x48] sm:$0xff]  ;;  %v1383_v29 = vsub.f32 %v46_v2, %v65_v5 }
  0x2a   :  { %v1351_v12 = vpack.c.bf16 %v68_v6, %v65_v5  ;;  %v1355_v13 = vpack.c.bf16 %v74_v9, %v71_v8  ;;  %v86_v20 = vand.u32 4294901760, %v53_v17  ;;  %v89_v24 = vand.u32 4294901760, %v1365_v21  ;;  %v1375_v26 = vld [vmem:[#allocation3] sm:$0xf]  ;;  %v1379_v27 = vld [vmem:[#allocation6 + $0x50] sm:$0xff]  ;;  %v1396_v35 = vld [vmem:[#allocation6 + $0x60] sm:$0xff] }
  0x2b   :  { %v1361_v18 = vpack.c.bf16 %v80_v15, %v77_v14  ;;  %v92_v25 = vand.u32 4294901760, %v1367_v22  ;;  %v1381_v28 = vld [vmem:[#allocation6 + $0x58] sm:$0xff]  ;;  %v1386_v30 = vand.u32 4294901760, %v1375_v26  ;;  %v1388_v31 = vsub.f32 %v47_v3, %v68_v6  ;;  %v1400_v36 = vld [vmem:[#allocation6 + $0x68] sm:$0xff]  ;;  %v1420_v43 = vld [vmem:[#allocation6 + $0x70] sm:$0xff]  ;;  %s722_s18 = sshll.u32 %s1288_s17, 4  ;;  %s723_s18 = int_to_ptr.vmem [resolvable:$true] %s722_s18 }
  0x2c   :  { %1047 = vmatpush3.bf16.msra.mxu1 %v1351_v12  ;;  %1119 = vmatpush3.bf16.msra.mxu0 %v1351_v12  ;;  %v1371_v23 = vpack.c.bf16 %v86_v20, %v83_v19  ;;  %v95_v33 = vand.u32 4294901760, %v1379_v27  ;;  %v98_v34 = vand.u32 4294901760, %v1381_v28  ;;  %v1402_v37 = vsub.f32 %v48_v4, %v71_v8  ;;  %v1422_v44 = vld [vmem:[#allocation6 + $0x78] sm:$0xff]  ;;  %p1258_p3 = scmp.lt.s32.totalorder %s723_s18, %s723_s18 }
  0x2d   :  { %1048 = vmatprep.subr.bf16.mxu1 %v1285_v0  ;;  %1120 = vmatprep.subr.bf16.mxu0 %v1285_v0  ;;  %v1392_v32 = vpack.c.bf16 %v92_v25, %v89_v24  ;;  %v1404_v38 = vsub.f32 %v49_v7, %v74_v9  ;;  %v101_v39 = vand.u32 4294901760, %v1396_v35  ;;  %v1409_v40 = vsub.f32 %v1375_v26, %v1386_v30 }
  0x2e   :  { %v1417_v41 = vpack.c.bf16 %v98_v34, %v95_v33  ;;  %v104_v42 = vand.u32 4294901760, %v1400_v36  ;;  %v158_v45 = vand.u32 4294901760, %v1383_v29  ;;  %v165_v46 = vand.u32 4294901760, %v1388_v31 }
  0x2f   :  { %v1428_v47 = vsub.f32 %v50_v10, %v77_v14  ;;  %v1430_v48 = vsub.f32 %v51_v11, %v80_v15  ;;  %v107_v49 = vand.u32 4294901760, %v1420_v43  ;;  %v110_v50 = vand.u32 4294901760, %v1422_v44 }
  0x30   :  { %1050 = vmatpush3.bf16.msra.mxu1 %v1355_v13  ;;  %1122 = vmatpush3.bf16.msra.mxu0 %v1355_v13  ;;  %v147_v51 = vand.u32 4294901760, %v1409_v40  ;;  %v172_v52 = vand.u32 4294901760, %v1402_v37  ;;  %v1442_v53 = vpack.c.bf16 %v104_v42, %v101_v39  ;;  %v159_v54 = vsub.f32 %v1383_v29, %v158_v45 }
  0x31   :  { %1051 = vmatprep.subr.bf16.mxu1 %v1285_v0  ;;  %1123 = vmatprep.subr.bf16.mxu0 %v1285_v0  ;;  %v166_v55 = vsub.f32 %v1388_v31, %v165_v46  ;;  %v179_v56 = vand.u32 4294901760, %v1404_v38  ;;  %v1449_v57 = vsub.f32 %v52_v16, %v83_v19  ;;  %v1451_v58 = vsub.f32 %v53_v17, %v86_v20 }
  0x32   :  { %v148_v59 = vsub.f32 %v1409_v40, %v147_v51  ;;  %v173_v60 = vsub.f32 %v1402_v37, %v172_v52  ;;  %v186_v61 = vand.u32 4294901760, %v1428_v47  ;;  %v193_v62 = vand.u32 4294901760, %v1430_v48 }
  0x33   :  { %v1463_v63 = vpack.c.bf16 %v110_v50, %v107_v49  ;;  %v160_v2 = vand.u32 4294901760, %v159_v54  ;;  %v167_v3 = vand.u32 4294901760, %v166_v55  ;;  %v180_v4 = vsub.f32 %v1404_v38, %v179_v56 }
  0x34   :  { %1053 = vmatpush3.bf16.msra.mxu1 %v1361_v18  ;;  %1125 = vmatpush3.bf16.msra.mxu0 %v1361_v18  ;;  %v1469_v5 = vsub.f32 %v1365_v21, %v89_v24  ;;  %v1472_v6 = vsub.f32 %v1367_v22, %v92_v25  ;;  %v1142_v7 = vpack.c.bf16 %v165_v46, %v158_v45  ;;  %v149_v8 = vand.u32 4294901760, %v148_v59 }
  0x35   :  { %1054 = vmatprep.subr.bf16.mxu1 %v1285_v0  ;;  %1126 = vmatprep.subr.bf16.mxu0 %v1285_v0  ;;  %v174_v9 = vand.u32 4294901760, %v173_v60  ;;  %v187_v10 = vsub.f32 %v1428_v47, %v186_v61  ;;  %v194_v11 = vsub.f32 %v1430_v48, %v193_v62  ;;  %v1070_v14 = vpack.c.bf16 %v167_v3, %v160_v2 }
  0x36   :  { %v181_v15 = vand.u32 4294901760, %v180_v4  ;;  %v200_v16 = vand.u32 4294901760, %v1449_v57  ;;  %v207_v17 = vand.u32 4294901760, %v1451_v58  ;;  %v1485_v19 = vsub.f32 %v1379_v27, %v95_v33 }
  0x37   :  { %v1490_v20 = vsub.f32 %v1381_v28, %v98_v34  ;;  %v1145_v21 = vpack.c.bf16 %v179_v56, %v172_v52  ;;  %v188_v22 = vand.u32 4294901760, %v187_v10  ;;  %v195_v24 = vand.u32 4294901760, %v194_v11 }
  0x38   :  { %1056 = vmatpush3.bf16.msra.mxu1 %v1371_v23  ;;  %1128 = vmatpush3.bf16.msra.mxu0 %v1371_v23  ;;  %v214_v25 = vand.u32 4294901760, %v1469_v5  ;;  %v1073_v45 = vpack.c.bf16 %v181_v15, %v174_v9  ;;  %v201_v46 = vsub.f32 %v1449_v57, %v200_v16  ;;  %v208_v27 = vsub.f32 %v1451_v58, %v207_v17 }
  0x39   :  { %1057 = vmatprep.subr.bf16.mxu1 %v1285_v0  ;;  %1129 = vmatprep.subr.bf16.mxu0 %v1285_v0  ;;  %v221_v33 = vand.u32 4294901760, %v1472_v6  ;;  %v1501_v28 = vsub.f32 %v1396_v35, %v101_v39  ;;  %v1506_v34 = vsub.f32 %v1400_v36, %v104_v42  ;;  %v1148_v52 = vpack.c.bf16 %v193_v62, %v186_v61 }
  0x3a   :  { %v215_v54 = vsub.f32 %v1469_v5, %v214_v25  ;;  %v228_v55 = vand.u32 4294901760, %v1485_v19  ;;  %v202_v35 = vand.u32 4294901760, %v201_v46  ;;  %v209_v39 = vand.u32 4294901760, %v208_v27 }
  0x3b   :  { %v222_v56 = vsub.f32 %v1472_v6, %v221_v33  ;;  %v235_v36 = vand.u32 4294901760, %v1490_v20  ;;  %v1521_v42 = vsub.f32 %v1420_v43, %v107_v49  ;;  %v1526_v59 = vsub.f32 %v1422_v44, %v110_v50 }
  0x3c   :  { %1059 = vmatpush3.bf16.msra.mxu1 %v1392_v32  ;;  %1131 = vmatpush3.bf16.msra.mxu0 %v1392_v32  ;;  %v1151_v60 = vpack.c.bf16 %v207_v17, %v200_v16  ;;  %v216_v61 = vand.u32 4294901760, %v215_v54  ;;  %v229_v62 = vsub.f32 %v1485_v19, %v228_v55  ;;  %v242_v2 = vand.u32 4294901760, %v1501_v28 }
  0x3d   :  { %1060 = vmatprep.subr.bf16.mxu1 %v1285_v0  ;;  %1132 = vmatprep.subr.bf16.mxu0 %v1285_v0  ;;  %v1079_v3 = vpack.c.bf16 %v209_v39, %v202_v35  ;;  %v223_v4 = vand.u32 4294901760, %v222_v56  ;;  %v249_v43 = vand.u32 4294901760, %v1506_v34  ;;  %v1154_v44 = vpack.c.bf16 %v221_v33, %v214_v25 }
  0x3e   :  { %v230_v49 = vand.u32 4294901760, %v229_v62  ;;  %v243_v50 = vsub.f32 %v1501_v28, %v242_v2  ;;  %v1157_v15 = vpack.c.bf16 %v235_v36, %v228_v55  ;;  %v1097_v54 = vpack.c.bf16 %v1404_v38, %v1402_v37 }
  0x3f   :  { %v1082_v9 = vpack.c.bf16 %v223_v4, %v216_v61  ;;  %v250_v11 = vsub.f32 %v1506_v34, %v249_v43 }
  0x40   :  { %1062 = vmatpush3.bf16.msra.mxu1 %v1417_v41  ;;  %1134 = vmatpush3.bf16.msra.mxu0 %v1417_v41  ;;  %v244_v16 = vand.u32 4294901760, %v243_v50 }
  0x41   :  { %1063 = vmatprep.subr.bf16.mxu1 %v1285_v0  ;;  %1135 = vmatprep.subr.bf16.mxu0 %v1285_v0 }
  0x44   :  { %1065 = vmatpush3.bf16.msra.mxu1 %v1442_v53  ;;  %1137 = vmatpush3.bf16.msra.mxu0 %v1442_v53 }
  0x45   :  { %1066 = vmatprep.subr.bf16.mxu1 %v1285_v0  ;;  %1138 = vmatprep.subr.bf16.mxu0 %v1285_v0 }
  0x48   :  { %1068 = vmatpush3.bf16.msra.mxu1 %v1463_v63  ;;  %1140 = vmatpush3.bf16.msra.mxu0 %v1463_v63 }
  0x49   :  { %1069 = vmatprep.subr.bf16.mxu1 %v1285_v0  ;;  %1141 = vmatprep.subr.bf16.mxu0 %v1285_v0 }
  0x4b   :  { %868 = vmatmul.mubr.f32.vlgmr.msra.gmra.mrb[0].mxu1 %v149_v8  ;;  %973 = vmatmul.mubr.f32.vlgmr.msra.gmra.mrb[0].mxu0 %v147_v51  ;;  %v1076_v51 = vpack.c.bf16 %v195_v24, %v188_v22  ;;  %v256_v8 = vand.u32 4294901760, %v1521_v42 }
  0x4c   :  { %1071 = vmatpush3.bf16.msra.mxu1 %v1070_v14  ;;  %1143 = vmatpush3.bf16.msra.mxu0 %v1142_v7  ;;  %v236_v7 = vsub.f32 %v1490_v20, %v235_v36  ;;  %v263_v14 = vand.u32 4294901760, %v1526_v59 }
  0x4d   :  { %1072 = vmatprep.subr.bf16.mxu1 %v1285_v0  ;;  %1144 = vmatprep.subr.bf16.mxu0 %v1285_v0  ;;  %v257_v22 = vsub.f32 %v1521_v42, %v256_v8 }
  0x4e   :  { %902 = vmatprep.mubr.msk.f32.mxu1 %vm1286_vm0, %v1287_v1  ;;  %1007 = vmatprep.mubr.msk.f32.mxu0 %vm1286_vm0, %v1287_v1  ;;  %v237_v10 = vand.u32 4294901760, %v236_v7  ;;  %v264_v24 = vsub.f32 %v1526_v59, %v263_v14 }
  0x4f   :  { %v258_v46 = vand.u32 4294901760, %v257_v22 }
  0x50   :  { %1074 = vmatpush3.bf16.msra.mxu1 %v1073_v45  ;;  %1146 = vmatpush3.bf16.msra.mxu0 %v1145_v21  ;;  %v1085_v17 = vpack.c.bf16 %v237_v10, %v230_v49  ;;  %v251_v21 = vand.u32 4294901760, %v250_v11  ;;  %v1160_v45 = vpack.c.bf16 %v249_v43, %v242_v2  ;;  %v265_v27 = vand.u32 4294901760, %v264_v24 }
  0x51   :  { %1075 = vmatprep.subr.bf16.mxu1 %v1285_v0  ;;  %1147 = vmatprep.subr.bf16.mxu0 %v1285_v0 }
  0x52   :  { %v1088_v25 = vpack.c.bf16 %v251_v21, %v244_v16  ;;  %v1091_v33 = vpack.c.bf16 %v265_v27, %v258_v46 }
  0x54   :  { %1077 = vmatpush3.bf16.msra.mxu1 %v1076_v51  ;;  %1149 = vmatpush3.bf16.msra.mxu0 %v1148_v52  ;;  %v1163_v51 = vpack.c.bf16 %v263_v14, %v256_v8  ;;  %v1094_v52 = vpack.c.bf16 %v1388_v31, %v1383_v29  ;;  %v1100_v29 = vpack.c.bf16 %v1430_v48, %v1428_v47  ;;  %v63_v31 = vstv %s1618_s3  ;;  %s1253_s3 = scalar_lea.vmem %s723_s18, 64 }
  0x55   :  { %1078 = vmatprep.subr.bf16.mxu1 %v1285_v0  ;;  %1150 = vmatprep.subr.bf16.mxu0 %v1285_v0  ;;  %p1254_p2 = scmp.ne.s32.totalorder %s723_s18, %s1253_s3  ;;  %p1259_p4 = scmp.lt.s32.totalorder %s1253_s3, %s1253_s3 }
  0x57   :  { %p1260_p5 = por %p1259_p4, %p1258_p3 }
  0x58   :  { %1080 = vmatpush3.bf16.msra.mxu1 %v1079_v3  ;;  %1152 = vmatpush3.bf16.msra.mxu0 %v1151_v60 }
  0x59   :  { %1081 = vmatprep.subr.bf16.mxu1 %v1285_v0  ;;  %1153 = vmatprep.subr.bf16.mxu0 %v1285_v0  ;;  %p1261_p6 = pnand %p1260_p5, %p1254_p2 }
  0x5c   :  { %1083 = vmatpush3.bf16.msra.mxu1 %v1082_v9  ;;  %1155 = vmatpush3.bf16.msra.mxu0 %v1154_v44 }
  0x5d   :  { %1084 = vmatprep.subr.bf16.mxu1 %v1285_v0  ;;  %1156 = vmatprep.subr.bf16.mxu0 %v1285_v0 }
  0x60   :  { %1086 = vmatpush3.bf16.msra.mxu1 %v1085_v17  ;;  %1158 = vmatpush3.bf16.msra.mxu0 %v1157_v15 }
  0x61   :  { %1087 = vmatprep.subr.bf16.mxu1 %v1285_v0  ;;  %1159 = vmatprep.subr.bf16.mxu0 %v1285_v0 }
  0x64   :  { %1089 = vmatpush3.bf16.msra.mxu1 %v1088_v25  ;;  %1161 = vmatpush3.bf16.msra.mxu0 %v1160_v45 }
  0x65   :  { %1090 = vmatprep.subr.bf16.mxu1 %v1285_v0  ;;  %1162 = vmatprep.subr.bf16.mxu0 %v1285_v0 }
  0x68   :  { %1092 = vmatpush3.bf16.msra.mxu1 %v1091_v33  ;;  %1164 = vmatpush3.bf16.msra.mxu0 %v1163_v51 }
  0x69   :  { %1093 = vmatprep.subr.bf16.mxu1 %v1285_v0  ;;  %1165 = vmatprep.subr.bf16.mxu0 %v1285_v0 }
  0x6b   :  { %903 = vmatmul.mubr.f32.vlgmr.msra.gmra.mrb[0].mxu1 %v1386_v30  ;;  %1008 = vmatmul.mubr.f32.vlgmr.msra.gmra.mrb[0].mxu0 %v1386_v30 }
  0x6c   :  { %1095 = vmatpush3.bf16.msra.mxu1 %v1094_v52  ;;  %1167 = vmatpush3.bf16.msra.mxu0 %v1351_v12  ;;  %v1103_v12 = vpack.c.bf16 %v1451_v58, %v1449_v57 }
  0x6d   :  { %1096 = vmatprep.subr.bf16.mxu1 %v1285_v0  ;;  %1168 = vmatprep.subr.bf16.mxu0 %v1285_v0 }
  0x6e   :  { %937 = vmatprep.mubr.msk.f32.mxu1 %vm1286_vm0, %v1287_v1  ;;  %1042 = vmatprep.mubr.msk.f32.mxu0 %vm1286_vm0, %v1287_v1  ;;  %v1106_v1 = vpack.c.bf16 %v1472_v6, %v1469_v5 }
  0x70   :  { %1098 = vmatpush3.bf16.msra.mxu1 %v1097_v54  ;;  %1170 = vmatpush3.bf16.msra.mxu0 %v1355_v13  ;;  %v1109_v13 = vpack.c.bf16 %v1490_v20, %v1485_v19 }
  0x71   :  { %1099 = vmatprep.subr.bf16.mxu1 %v1285_v0  ;;  %1171 = vmatprep.subr.bf16.mxu0 %v1285_v0 }
  0x74   :  { %1101 = vmatpush3.bf16.msra.mxu1 %v1100_v29  ;;  %1173 = vmatpush3.bf16.msra.mxu0 %v1361_v18  ;;  %v1112_v18 = vpack.c.bf16 %v1506_v34, %v1501_v28 }
  0x75   :  { %1102 = vmatprep.subr.bf16.mxu1 %v1285_v0  ;;  %1174 = vmatprep.subr.bf16.mxu0 %v1285_v0 }
  0x78   :  { %1104 = vmatpush3.bf16.msra.mxu1 %v1103_v12  ;;  %1176 = vmatpush3.bf16.msra.mxu0 %v1371_v23  ;;  %v1115_v23 = vpack.c.bf16 %v1526_v59, %v1521_v42 }
  0x79   :  { %1105 = vmatprep.subr.bf16.mxu1 %v1285_v0  ;;  %1177 = vmatprep.subr.bf16.mxu0 %v1285_v0 }
  0x7c   :  { %1107 = vmatpush3.bf16.msra.mxu1 %v1106_v1  ;;  %1179 = vmatpush3.bf16.msra.mxu0 %v1392_v32 }
  0x7d   :  { %1108 = vmatprep.subr.bf16.mxu1 %v1285_v0  ;;  %1180 = vmatprep.subr.bf16.mxu0 %v1285_v0 }
  0x80   :  { %1110 = vmatpush3.bf16.msra.mxu1 %v1109_v13  ;;  %1182 = vmatpush3.bf16.msra.mxu0 %v1417_v41 }
  0x81   :  { %1111 = vmatprep.subr.bf16.mxu1 %v1285_v0  ;;  %1183 = vmatprep.subr.bf16.mxu0 %v1285_v0 }
  0x84   :  { %1113 = vmatpush3.bf16.msra.mxu1 %v1112_v18  ;;  %1185 = vmatpush3.bf16.msra.mxu0 %v1442_v53 }
  0x85   :  { %1114 = vmatprep.subr.bf16.mxu1 %v1285_v0  ;;  %1186 = vmatprep.subr.bf16.mxu0 %v1285_v0  ;;  %v732_v0 = vld [vmem:[%s1617_s2] ss:$0 sm:$0xff] }
  0x88   :  { %1116 = vmatpush3.bf16.msra.mxu1 %v1115_v23  ;;  %1188 = vmatpush3.bf16.msra.mxu0 %v1463_v63 }
  0x8b   :  { %938 = vmatmul.mubr.f32.vlgmr.msra.gmra.mrb[0].mxu1 %v1409_v40  ;;  %1043 = vmatmul.mubr.f32.vlgmr.msra.gmra.mrb[0].mxu0 %v1386_v30 }
 0x15e   :  { %v406_v32 = vpop.f32.mrb[0].mxu1  ;;  %v701_v37 = vpop.f32.mrb[0].mxu0 }
 0x15f   :  { %v1189_v38 = vadd.f32 %v406_v32, %v63_v31  ;;  %v939_v41 = vpop.f32.mrb[1].mxu1  ;;  %v1044_v47 = vpop.f32.mrb[1].mxu0 }
 0x161   :  { %v1190_v48 = vadd.f32 %v1189_v38, %v701_v37 }
 0x163   :  { %1207 = vtanh.f32 %v1190_v48 }
 0x16d   :  { %v1208_v53 = vpop.eup %1207 }
 0x16e   :  { %v713_v40 = vmul.f32 %v1208_v53, %v732_v0 }
 0x170   :  { %v714_v30 = vadd.f32 %v713_v40, %v1375_v26 }
 0x172   :  { %715 = vst [vmem:[#allocation8] sm:$0xf] %v714_v30 }
 0x173   :  { %1264 = shalt.err (!%p1261_p6)
}
 0x174   :  { %s1265_s21 = scalar_lea.hbm %s1619_s4, 64 }
 0x175   :  { %p1266_p7 = scmp.ne.s32.totalorder %s1619_s4, %s1265_s21  ;;  %p1269_p8 = scmp.lt.u32.totalorder %s1265_s21, %s1619_s4 }
 0x177   :  { %p1271_p9 = pnand %p1269_p8, %p1266_p7 }
 0x179   :  { %1274 = shalt.err (!%p1271_p9)
}
 0x17a   :  { %725 = dma.vmem_to_hbm [thread:$0]  %s723_s18, 64, %s1619_s4, [#allocation5]  }
 0x17b   :  { %1279 = dma.done.wait [#allocation5], 64  }
 0x17c   :  { %1280 = vsyncadd [#allocation5], 4294967232 }
 0x17d   :  { %729 = vsyncpa [#allocation4], 1 }
 0x17e   :  { %730 = vsyncpa [#allocation7], 1 }
 0x17f   :  { %731 = vsyncpa [#allocation5], 1 }

</bundles_post_ra>
